<compile_context>
chip_gen: v5e
topology: v5e:2x2
jax: 0.10.0
libtpu: 0.0.40
codegen_flags: <defaults>
</compile_context>

<pallas_src>
import functools

import jax
import jax.numpy as jnp
from jax.experimental import pallas as pl
from jax.experimental.pallas import tpu as pltpu


def _round_up(v, m):
    return ((v + m - 1) // m) * m


def _head_kernel(x_ref, w_ref, out_ref, *scratch, single_s):
    # x_ref:   (tile_b, 1, C, tile_s)   NCDHW-native tile (S on the lane axis)
    # w_ref:   (1, C, NCLS)             this cell's slice of (w / S), class-padded
    # out_ref: (1, tile_b, NCLS)        per-cell partial logits (bias added outside)
    # scratch: [] or [(tile_b, C, tile_s) f32]  running spatial partial sums
    si = pl.program_id(2)
    n_s = pl.num_programs(2)

    def fc(pooled):  # pooled: (tile_b, C) f32 spatial sum for this cell
        out_ref[0] = jnp.dot(pooled, w_ref[0],
                             preferred_element_type=jnp.float32).astype(out_ref.dtype)

    if single_s:
        # Whole spatial extent in one block: one cross-lane reduce + one small dot.
        fc(jnp.sum(x_ref[:, 0, :, :].astype(jnp.float32), axis=-1))
    else:
        sum_ref = scratch[0]

        @pl.when(si == 0)
        def _():
            sum_ref[...] = jnp.zeros_like(sum_ref)

        # Element-wise (VPU) partial-sum accumulation; the cross-lane (XLU)
        # reduce is deferred to the last spatial step of this cell.
        sum_ref[...] += x_ref[:, 0, :, :].astype(jnp.float32)

        @pl.when(si == n_s - 1)
        def _():
            fc(jnp.sum(sum_ref[...], axis=-1))


def swin_pretrain_head(x, w, b, *, n_cells, max_block_bytes=None):
    """SwinPretrainHead forward (CUBICPUZZLE3D, eval mode).

    x: (B*n_cells, C, D, H, W) backbone features (NCDHW, any float dtype)
    w: (n_cells*C, num_classes) fc_cls weight (input-major: y = feat @ w + b)
    b: (num_classes,) fc_cls bias
    """
    BN, C, D, H, W = x.shape
    assert BN % n_cells == 0
    B = BN // n_cells
    S = D * H * W
    num_classes = w.shape[1]
    itemsize = x.dtype.itemsize

    # Free view only: NO transpose, NO pad, NO dtype upcast of the activation.
    x4 = x.reshape(B, n_cells, C, S)

    # ---- batch tile: a multiple-of-8 divisor of B (<=32), else the full batch ----
    mult8 = [t for t in range(8, min(B, 32) + 1, 8) if B % t == 0]
    tile_b = max(mult8) if mult8 else B

    # ---- spatial tile: whole S if it fits the block budget, else a multiple-of-128
    #      divisor of S; zero-pad S (one extra copy) only as a last resort. ----
    if max_block_bytes is None:
        # keep 2x double-buffered x + the f32 scratch comfortably under 32 MiB
        max_block_bytes = (8 << 20) if itemsize >= 4 else (6 << 20)
    S_pad = S
    if tile_b * C * S * itemsize <= max_block_bytes:
        tile_s = S                                  # single spatial block per cell
    else:
        want = max(128, ((max_block_bytes // (tile_b * C * itemsize)) // 128) * 128)
        divs = [d for d in range(128, S + 1, 128) if S % d == 0 and d <= want]
        if divs:
            tile_s = divs[-1]
        else:
            # TODO(synk): S has no suitable multiple-of-128 divisor; the spatial
            # zero-pad costs one extra HBM copy of x (zeros add nothing to the sums).
            tile_s = want
            S_pad = _round_up(S, tile_s)
            x4 = jnp.pad(x4, ((0, 0), (0, 0), (0, 0), (0, S_pad - S)))
    n_s = S_pad // tile_s
    single_s = n_s == 1

    # ---- weights: fold 1/S (avg pool) in, split per cell, lane-pad classes ----
    NCLS = _round_up(max(num_classes, 128), 128)
    w3 = (w.astype(jnp.float32) / float(S)).reshape(n_cells, C, num_classes)
    w3 = jnp.pad(w3, ((0, 0), (0, 0), (0, NCLS - num_classes)))

    grid = (n_cells, B // tile_b, n_s)

    # ---- VMEM budget from the actual lane/sublane-padded block sizes; cap 32 MiB ----
    sub = 8 if itemsize >= 4 else (16 if itemsize == 2 else 32)
    blk_x = tile_b * _round_up(C, sub) * _round_up(tile_s, 128) * itemsize
    blk_w = _round_up(C, 8) * NCLS * 4
    blk_o = _round_up(tile_b, 8) * NCLS * 4
    blk_s = 0 if single_s else tile_b * _round_up(C, 8) * _round_up(tile_s, 128) * 4
    vmem_limit = int(min(32 << 20,
                         max(16 << 20,
                             2 * (blk_x + blk_w + blk_o) + blk_s + (4 << 20))))

    cost = pl.CostEstimate(
        flops=B * n_cells * C * S + 2 * B * n_cells * C * num_classes,
        transcendentals=0,
        bytes_accessed=B * n_cells * C * S_pad * itemsize
        + n_cells * C * NCLS * 4 + n_cells * B * NCLS * 4,
    )

    parts = pl.pallas_call(
        functools.partial(_head_kernel, single_s=single_s),
        out_shape=jax.ShapeDtypeStruct((n_cells, B, NCLS), jnp.float32),
        grid_spec=pltpu.PrefetchScalarGridSpec(
            num_scalar_prefetch=0,
            grid=grid,
            in_specs=[
                # NOTE: default double-buffering; bump to pipeline_mode=pl.Buffered(3)
                # only if a profile of this pure-streaming kernel shows DMA bubbles.
                pl.BlockSpec((tile_b, 1, C, tile_s),
                             lambda ci, bi, si: (bi, ci, 0, si)),
                # Per-cell weight slice; with the cell axis OUTERMOST this block is
                # fetched exactly n_cells times total (no per-batch-tile refetch).
                pl.BlockSpec((1, C, NCLS), lambda ci, bi, si: (ci, 0, 0)),
            ],
            out_specs=pl.BlockSpec((1, tile_b, NCLS),
                                   lambda ci, bi, si: (ci, bi, 0)),
            scratch_shapes=([] if single_s
                            else [pltpu.VMEM((tile_b, C, tile_s), jnp.float32)]),
        ),
        compiler_params=pltpu.CompilerParams(
            dimension_semantics=("parallel", "parallel", "arbitrary"),
            vmem_limit_bytes=vmem_limit,
        ),
        cost_estimate=cost,
    )(x4, w3)

    # Tiny epilogue (B x NCLS per cell): summing the per-cell partial logits here
    # is what lets the cell axis be "parallel" across TensorCores on v7x.
    # TODO(synk): nn.Dropout is identity at inference; training-mode RNG dropout not implemented.
    return parts.sum(axis=0)[:, :num_classes] + b.astype(jnp.float32)


def reference(x, w, b, *, n_cells):
    BN, C, D, H, W = x.shape
    B = BN // n_cells
    pooled = jnp.mean(x.reshape(BN, C, -1).astype(jnp.float32), axis=-1)  # avg_pool + view
    feat = pooled.reshape(B, n_cells * C)                                 # CUBICPUZZLE3D rearrange
    return feat @ w.astype(jnp.float32) + b.astype(jnp.float32)


if __name__ == "__main__":
    # Small shapes consistent with the module.
    B = 2          # logical batch
    n_cells = 2    # puzzle cells -> input batch is B * n_cells
    C = 32         # channels of the backbone feature
    D = H = W = 4  # spatial dims fed to AdaptiveAvgPool3d
    num_classes = 8
    in_channels = n_cells * C   # fc_cls input features after the rearrange
    init_std = 0.01

    key = jax.random.PRNGKey(0)
    kx, kw, kx2 = jax.random.split(key, 3)
    x = jax.random.normal(kx, (B * n_cells, C, D, H, W), dtype=jnp.float32)
    w = init_std * jax.random.normal(kw, (in_channels, num_classes), dtype=jnp.float32)
    b = jnp.zeros((num_classes,), dtype=jnp.float32)

    out = jax.block_until_ready(swin_pretrain_head(x, w, b, n_cells=n_cells))
    ref = reference(x, w, b, n_cells=n_cells)
    assert out.shape == (B, num_classes)
    assert jnp.allclose(out, ref, atol=1e-5, rtol=1e-5), "mismatch vs reference (single-block path)"

    # Also exercise the spatially-tiled multi-step accumulation path by shrinking
    # the per-block budget (S = 256 -> tile_s = 128, 2 spatial steps per cell).
    D2, H2, W2 = 4, 8, 8
    x2 = jax.random.normal(kx2, (B * n_cells, C, D2, H2, W2), dtype=jnp.float32)
    out2 = jax.block_until_ready(
        swin_pretrain_head(x2, w, b, n_cells=n_cells, max_block_bytes=32 * 1024))
    ref2 = reference(x2, w, b, n_cells=n_cells)
    assert out2.shape == (B, num_classes)
    assert jnp.allclose(out2, ref2, atol=1e-5, rtol=1e-5), "mismatch vs reference (tiled path)"

    print("KERNEL_OK")
</pallas_src>

<mosaic_0001>
module attributes {stable_mosaic.version = 11 : i64} {
  func.func @_head_kernel(%arg0: i32, %arg1: i32, %arg2: i32, %arg3: memref<2x1x32x64xf32, #tpu.memory_space<vmem>>, %arg4: memref<1x32x128xf32, #tpu.memory_space<vmem>>, %arg5: memref<1x2x128xf32, #tpu.memory_space<vmem>>) attributes {dimension_semantics = [#tpu.dimension_semantics<parallel>, #tpu.dimension_semantics<parallel>, #tpu.dimension_semantics<arbitrary>], iteration_bounds = array<i64: 2, 1, 1>, scalar_prefetch = 0 : i64, scratch_operands = 0 : i64, tpu.core_type = #tpu.core_type<tc>, window_params = [{transform_indices = @transform_0, window_bounds = array<i64: 2, 1, 32, 64>}, {transform_indices = @transform_1, window_bounds = array<i64: 1, 32, 128>}, {transform_indices = @transform_2, window_bounds = array<i64: 1, 2, 128>}]} {
    %c0 = arith.constant 0 : index
    %c0_0 = arith.constant 0 : index
    %c0_1 = arith.constant 0 : index
    %c0_2 = arith.constant 0 : index
    %0 = vector.load %arg3[%c0, %c0_0, %c0_1, %c0_2] : memref<2x1x32x64xf32, #tpu.memory_space<vmem>>, vector<2x1x32x64xf32>
    %1 = vector.shape_cast %0 : vector<2x1x32x64xf32> to vector<2x32x64xf32>
    %cst = arith.constant dense<0.000000e+00> : vector<2x32xf32>
    %2 = vector.multi_reduction <add>, %1, %cst [2] : vector<2x32x64xf32> to vector<2x32xf32>
    %c0_3 = arith.constant 0 : index
    %c0_4 = arith.constant 0 : index
    %c0_5 = arith.constant 0 : index
    %3 = vector.load %arg4[%c0_3, %c0_4, %c0_5] : memref<1x32x128xf32, #tpu.memory_space<vmem>>, vector<1x32x128xf32>
    %4 = vector.shape_cast %3 : vector<1x32x128xf32> to vector<32x128xf32>
    %cst_6 = arith.constant dense<0.000000e+00> : vector<2x128xf32>
    %5 = tpu.matmul %2, %4, %cst_6 {dimension_numbers = #tpu.dot_dimension_numbers<[1], [0], [0], [1], [0, 0, 1, 1], [], []>} : vector<2x32xf32>, vector<32x128xf32>, vector<2x128xf32> -> vector<2x128xf32>
    %c0_7 = arith.constant 0 : index
    %c0_8 = arith.constant 0 : index
    %c0_9 = arith.constant 0 : index
    %6 = vector.load %arg5[%c0_7, %c0_8, %c0_9] : memref<1x2x128xf32, #tpu.memory_space<vmem>>, vector<1x2x128xf32>
    %7 = vector.shape_cast %6 : vector<1x2x128xf32> to vector<2x128xf32>
    %8 = vector.shape_cast %5 : vector<2x128xf32> to vector<1x2x128xf32>
    tpu.vector_store %arg5[%c0_7, %c0_8, %c0_9], %8 {strides = array<i32>} : memref<1x2x128xf32, #tpu.memory_space<vmem>>, vector<1x2x128xf32>,
    return
  }
  func.func @transform_0(%arg0: i32, %arg1: i32, %arg2: i32) -> (i32, i32, i32, i32) {
    %c0_i32 = arith.constant 0 : i32
    %c0_i32_0 = arith.constant 0 : i32
    return %arg1, %arg0, %c0_i32, %arg2 : i32, i32, i32, i32
  }
  func.func @transform_1(%arg0: i32, %arg1: i32, %arg2: i32) -> (i32, i32, i32) {
    %c0_i32 = arith.constant 0 : i32
    %c0_i32_0 = arith.constant 0 : i32
    %c0_i32_1 = arith.constant 0 : i32
    return %arg0, %c0_i32, %c0_i32_0 : i32, i32, i32
  }
  func.func @transform_2(%arg0: i32, %arg1: i32, %arg2: i32) -> (i32, i32, i32) {
    %c0_i32 = arith.constant 0 : i32
    %c0_i32_0 = arith.constant 0 : i32
    return %arg0, %arg1, %c0_i32 : i32, i32, i32
  }
}

</mosaic_0001>

<bundles_post_ra>
// kernel: tpu_custom_call.1
= control target key start
LH: loop header
LB: loop body
LE: loop exit
PB: predicated region body
PF: predicated region fallthrough
CT: control target
= control target key end

     0   :  { %s884_s0 = inlined_call_operand.hbm [shape: f32[2,2,32,64], index: 0, kind: input, shape index: {}]   ;;  %s885_s1 = inlined_call_operand.hbm [shape: f32[2,32,128], index: 1, kind: input, shape index: {}]   ;;  %s886_s2 = inlined_call_operand.hbm [shape: f32[2,2,128], index: 2, kind: output, shape index: {}]  }
   0x1   :  { %887 = sst [smem:[#allocation14_spill]] %s884_s0 }
   0x2   :  { %7 = vsyncpa [#allocation3], 0 }
   0x3   :  { %9 = vsyncpa [#allocation3 + $0x1], 0 }
   0x4   :  { %10 = vsyncpa [#allocation6], 0 }
   0x5   :  { %12 = vsyncpa [#allocation6 + $0x1], 0 }
   0x6   :  { %13 = vsyncpa [#allocation4], 0 }
   0x7   :  { %15 = vsyncpa [#allocation4 + $0x1], 0  ;;  %s713_s9 = smov 0   ;;  %s715_s10 = smov 0  }
   0x8   :  { %s717_s11 = smov 0   ;;  %s719_s12 = smov 0  }
   0x9   :  { %s721_s13 = smov 0   ;;  %s723_s14 = smov 0  }
   0xa LB: > { %s477_s15 = sadd.s32 4294967295, %s688_s14   ;;  %s478_s16 = sadd.s32 4294967294, %s688_s14   ;;  %s688_s14 = sphi %s723_s14, %s21_s14   ;;  %s684_s13 = sphi %s721_s13, %s897_s13   ;;  %s680_s12 = sphi %s719_s12, %s896_s12   ;;  %s676_s11 = sphi %s717_s11, %s895_s11   ;;  %s672_s10 = sphi %s715_s10, %s894_s10   ;;  %s668_s9 = sphi %s713_s9, %s893_s9  }
   0xb   : > { %s40_s17 = sadd.s32 1, %s684_s13  ;;  %s51_s18 = sadd.s32 1, %s676_s11 }
   0xc   : > { %p42_p0 = scmp.ge.s32.totalorder %s40_s17, 2  ;;  %p58_p1 = scmp.ne.s32.totalorder %s676_s11, %s672_s10 }
   0xd   : > { %p59_p2 = scmp.eq.s32.totalorder %s688_s14, 0  ;;  %p64_p3 = scmp.ne.s32.totalorder %s672_s10, %s668_s9 }
   0xe   : > { %s899_s17 = smov (%p42_p0, %s40_s17), 0  ;;  %p65_p5 = scmp.eq.s32.totalorder %s477_s15, 0 }
   0xf   : > { %p754_p4 = por %p59_p2, %p58_p1  ;;  %s45_s20 = ssub.s32 %s684_s13, %s899_s17 }
  0x10   : > { %p116_p6 = scmp.eq.s32.totalorder %s477_s15, 1  ;;  %p49_p7 = scmp.eq.s32.totalorder %s45_s20, 0 }
  0x11   : > { %p760_p8 = por %p65_p5, %p64_p3  ;;  %p122_p10 = scmp.eq.s32.totalorder %s478_s16, 1 }
  0x12   : > { %p764_p9 = por %p116_p6, %p58_p1  ;;  %p480_p12 = scmp.ge.s32.totalorder %s688_s14, 2 }
  0x13   : > { %s769_s23 = scalar_select %p49_p7, %s676_s11, %s51_s18  }
  0x14   : > { %p771_p11 = por %p122_p10, %p64_p3  ;;  %138 = sbr.rel (%p480_p12) target bundleno = 44 (0x2c), region = 16 }
  0x19   : > { %s779_s25 = sand.u32 1, %s676_s11   ;;  %s498_s26 = sshll.u32 %s684_s13, 5 }
  0x1a   : > { %s481_s27 = sshll.u32 %s779_s25, 6  ;;  %s892_s0 = sld [smem:[#allocation14_spill]] }
  0x1b   : > { %s500_s3 = scalar_select %p754_p4, [#allocation0], [#allocation10] }
  0x1c   : > { %s146_s5 = scalar_lea.vmem [#allocation2], %s481_s27  ;;  %s690_s8 = smov 1024  }
  0x1d   : > { %s170_s6 = sshll.u32 %s146_s5, 4  ;;  %s160_s7 = sld [smem:[%s500_s3]]   ;;  %s171_s6 = int_to_ptr.vmem [resolvable:$true] %s170_s6 }
  0x1e   : > { %501 = sst [smem:[#allocation9]] (%p754_p4), %s690_s8  ;;  %s691_s15 = smov 512  }
  0x1f   : > { %502 = sst [smem:[#allocation9 + $0x1]] (%p754_p4), %s691_s15  ;;  %s692_s16 = smov 4  }
  0x20   : > { %s155_s30 = scalar_lea.hbm %s892_s0, %s498_s26  ;;  %503 = sst [smem:[#allocation9 + $0x2]] (%p754_p4), %s692_s16 }
  0x21   : > { %s168_s4 = sshll.u32 %s155_s30, 4  ;;  %s693_s18 = smov 128   ;;  %s169_s4 = int_to_ptr.hbm [resolvable:$true] %s168_s4 }
  0x22   : > { %504 = sst [smem:[#allocation9 + $0x3]] (%p754_p4), %s693_s18  ;;  %s694_s28 = smov 8  }
  0x23   : > { %s484_s20 = sshll.u32 %s160_s7, 26  ;;  %505 = sst [smem:[#allocation9 + $0x4]] (%p754_p4), %s693_s18 }
  0x24   : > { %s485_s27 = sadd.s32 134217728, %s484_s20  ;;  %506 = sst [smem:[#allocation9 + $0x5]] (%p754_p4), %s694_s28 }
  0x25   : > { %s143_s29 = scalar_lea.sflag [#allocation3], %s779_s25  ;;  %s695_s30 = smov [#allocation8]  }
  0x26   : > { %507 = dma.general (%p754_p4), %s169_s4, 1024, %s171_s6, %s143_s29, %s695_s30, [#allocation9], %s485_s27, 0  }
  0x27   : > { %s486_s3 = sshll.u32 %s779_s25, 5  ;;  %s202_s7 = scalar_lea.hbm %s885_s1, %s498_s26 }
  0x28   : > { %s203_s15 = sshll.u32 %s202_s7, 4  ;;  %s197_s16 = scalar_lea.vmem [#allocation5], %s486_s3  ;;  %s204_s15 = int_to_ptr.hbm [resolvable:$true] %s203_s15 }
  0x29   : > { %s205_s18 = sshll.u32 %s197_s16, 4  ;;  %s194_s20 = scalar_lea.sflag [#allocation6], %s779_s25  ;;  %s206_s18 = int_to_ptr.vmem [resolvable:$true] %s205_s18 }
  0x2a   : > { %s696_s28 = smov 128   ;;  %s697_s0 = smov 8  }
  0x2b   : > { %508 = dma.hbm_to_vmem [thread:$0]  (%p754_p4), %s204_s15, 512, %s206_s18, %s194_s20, %s696_s28, %s696_s28, %s697_s0  }
  0x2c PF: > { %p489_p13 = scmp.ge.s32.totalorder %s688_s14, 1  ;;  %p213_p0 = scmp.lt.s32.totalorder %s688_s14, 3 }
  0x2e   : > { %p214_p1 = pnand %p489_p13, %p213_p0 }
  0x2f   : > { %s817_s26 = sand.u32 (!%p214_p1), 1, %s672_s10  }
  0x30   : > { %217 = sbr.rel (%p214_p1) target bundleno = 325 (0x145), region = 28  ;;  %s490_s4 = sshll.u32 (!%p214_p1), %s817_s26, 6 }
  0x31   : > { %s220_s6 = scalar_lea.sflag (!%p214_p1), [#allocation3], %s817_s26  ;;  %s223_s25 = scalar_lea.vmem (!%p214_p1), [#allocation2], %s490_s4 }
  0x35   : > { %655 = dma.done.wait (%p760_p8), %s220_s6, 1024  }
  0x36   : > { %657 = vsyncadd (%p760_p8), %s220_s6, 4294966272  ;;  %s491_s0 = sshll.u32 %s817_s26, 5  ;;  %s230_s19 = scalar_lea.sflag [#allocation6], %s817_s26 }
  0x37   : > { %s827_s27 = scalar_lea.vmem [#allocation5], %s491_s0 }
  0x38   : > { %659 = dma.done.wait (%p760_p8), %s230_s19, 512  }
  0x39   : > { %661 = vsyncadd (%p760_p8), %s230_s19, 4294966784  ;;  %vm269_vm0 = vcmask 523264   ;;  %v265_v0 = vld [vmem:[%s223_s25 + $0x20] sm:$0xff]  ;;  %v263_v2 = vld [vmem:[%s223_s25 + $0x10] sm:$0xff]  ;;  %v306_v22 = vlaneseq  ;;  %vm311_vm1 = vcmask 130112   ;;  %vm315_vm2 = vcmask 195712  }
  0x3a   : > { %v261_v1 = vld [vmem:[%s223_s25] sm:$0xff]  ;;  %v282_v3 = vsel %vm269_vm0, %v265_v0, 0.0  ;;  %v276_v5 = vsel %vm269_vm0, %v263_v2, 0.0  ;;  %v266_v6 = vld [vmem:[%s223_s25 + $0x28] sm:$0xff]  ;;  %v267_v8 = vld [vmem:[%s223_s25 + $0x30] sm:$0xff]  ;;  %vm319_vm3 = vcmask 261312  }
  0x3b   : > { %v270_v4 = vsel %vm269_vm0, %v261_v1, 0.0  ;;  %283 = vadd.xlane.f32.xlu1 %v282_v3  ;;  %277 = vadd.xlane.f32.xlu2 %v276_v5  ;;  %v262_v7 = vld [vmem:[%s223_s25 + $0x8] sm:$0xff]  ;;  %v285_v9 = vsel %vm269_vm0, %v266_v6, 0.0  ;;  %v288_v11 = vsel %vm269_vm0, %v267_v8, 0.0  ;;  %v268_v12 = vld [vmem:[%s223_s25 + $0x38] sm:$0xff]  ;;  %v296_v17 = vld [vmem:[%s827_s27 + $0x10] sm:$0xff] }
  0x3c   : > { %271 = vadd.xlane.f32.xlu0 %v270_v4  ;;  %v273_v10 = vsel %vm269_vm0, %v262_v7, 0.0  ;;  %v264_v13 = vld [vmem:[%s223_s25 + $0x18] sm:$0xff]  ;;  %v291_v14 = vsel %vm269_vm0, %v268_v12, 0.0  ;;  %v295_v18 = vld [vmem:[%s827_s27 + $0x8] sm:$0xff]  ;;  %v294_v19 = vld [vmem:[%s827_s27] sm:$0xff]  ;;  %v307_v24 = vand.u32 127, %v306_v22 }
  0x3d   : > { %v279_v15 = vsel %vm269_vm0, %v264_v13, 0.0  ;;  %v297_v16 = vld [vmem:[%s827_s27 + $0x18] sm:$0xff]  ;;  %vm328_vm4 = vcmask 1041409   ;;  %vm330_vm5 = vcmask 261120   ;;  %s492_s21 = sshll.u32 %s817_s26, 1  ;;  %s495_s29 = sshll.u32 %s680_s12, 1 }
  0x3e   : > { %345 = vmatpush.msra.mxu0 %v297_v16  ;;  %v309_v25 = vadd.s32 4294967288, %v307_v24  ;;  %v313_v31 = vadd.s32 4294967280, %v307_v24  ;;  %v317_v34 = vadd.s32 4294967272, %v307_v24  ;;  %s366_s5 = scalar_lea.hbm %s886_s2, %s495_s29  ;;  %s259_s8 = scalar_lea.vmem [#allocation7], %s492_s21 }
  0x3f   : > { %s368_s7 = sshll.u32 %s259_s8, 4  ;;  %s370_s15 = sshll.u32 %s366_s5, 4  ;;  %s369_s7 = int_to_ptr.vmem [resolvable:$true] %s368_s7  ;;  %s371_s15 = int_to_ptr.hbm [resolvable:$true] %s370_s15 }
  0x40   : > { %346 = vmatpush.msra.mxu0 %v296_v17  ;;  %s355_s16 = scalar_lea.sflag [#allocation4], %s817_s26  ;;  %s616_s18 = sshra.s32 %s371_s15, 4  ;;  %s617_s18 = int_to_ptr.hbm [resolvable:$true] %s616_s18 }
  0x41   : > { %s618_s20 = scalar_lea.hbm %s617_s18, 2  ;;  %s622_s4 = scalar_lea.hbm %s886_s2, 4 }
  0x42   : > { %347 = vmatpush.msra.mxu0 %v295_v18  ;;  %p619_p2 = scmp.ne.s32.totalorder %s617_s18, %s618_s20  ;;  %p623_p5 = scmp.lt.s32.totalorder %s617_s18, %s886_s2 }
  0x43   : > { %286 = vadd.xlane.f32.xlu1 %v285_v9  ;;  %289 = vadd.xlane.f32.xlu2 %v288_v11  ;;  %p624_p6 = scmp.lt.s32.totalorder %s622_s4, %s618_s20 }
  0x44   : > { %274 = vadd.xlane.f32.xlu0 %v273_v10  ;;  %348 = vmatpush.msra.mxu0 %v294_v19  ;;  %p620_p3 = pnand %p619_p2, %p764_p9 }
  0x45   : > { %p625_p7 = por %p624_p6, %p623_p5 }
  0x46   : > { %p621_p4 = pneg %p620_p3 }
  0x48   : > { %p626_p8 = pnand %p625_p7, %p621_p4 }
  0x4b   : > { %292 = vadd.xlane.f32.xlu1 %v291_v14 }
  0x4c   : > { %280 = vadd.xlane.f32.xlu0 %v279_v15 }
  0xae   : > { %v284_v20 = vpop.xlane.xlu1 %283  ;;  %v278_v23 = vpop.xlane.xlu2 %277 }
  0xaf   : > { %v272_v21 = vpop.xlane.xlu0 %271  ;;  %v321_v32 = vperm.slane %v284_v20, %v307_v24  ;;  %v314_v38 = vperm.slane %v278_v23, %v313_v31 }
  0xb0   : > { %v308_v33 = vperm.slane %v272_v21, %v307_v24 }
  0xb6   : > { %v287_v26 = vpop.xlane.xlu1 %286  ;;  %v290_v30 = vpop.xlane.xlu2 %289 }
  0xb7   : > { %v275_v27 = vpop.xlane.xlu0 %274  ;;  %v322_v28 = vperm.slane %v287_v26, %v309_v25  ;;  %v324_v35 = vperm.slane %v290_v30, %v313_v31 }
  0xb8   : > { %v310_v29 = vperm.slane %v275_v27, %v309_v25 }
  0xb9   : > { %v323_v36 = vsel %vm311_vm1, %v322_v28, %v321_v32 }
  0xba   : > { %v312_v37 = vsel %vm311_vm1, %v310_v29, %v308_v33  ;;  %v325_v43 = vsel %vm315_vm2, %v324_v35, %v323_v36 }
  0xbb   : > { %v316_v44 = vsel %vm315_vm2, %v314_v38, %v312_v37 }
  0xbe   : > { %v293_v39 = vpop.xlane.xlu1 %292 }
  0xbf   : > { %v281_v40 = vpop.xlane.xlu0 %280  ;;  %v326_v41 = vperm.slane %v293_v39, %v317_v34 }
  0xc0   : > { %v318_v42 = vperm.slane %v281_v40, %v317_v34 }
  0xc1   : > { %v327_v46 = vsel %vm319_vm3, %v326_v41, %v325_v43 }
  0xc2   : > { %v320_v45 = vsel %vm319_vm3, %v318_v42, %v316_v44 }
  0xc3   : > { %v329_v47 = vsel %vm328_vm4, %v327_v46, %v320_v45 }
  0xc4   : > { %493 = vmatmul.msk.f32.vlgmr.msra.gmra.mxu0 %vm330_vm5, %v329_v47 }
 0x141   : > { %v350_v48 = vpop.f32.mrf.mxu0 }
 0x142   : > { %353 = vst [vmem:[%s259_s8] sm:$0x3] %v350_v48 }
 0x143   : > { %629 = shalt.err (!%p626_p8)
}
 0x144   : > { %511 = dma.vmem_to_hbm [thread:$0]  (%p764_p9), %s369_s7, 32, %s371_s15, %s355_s16  }
 0x145 PF: > { %s382_s26 = sand.u32 1, %s668_s9   ;;  %p514_p10 = pnand %p480_p12, %p771_p11 }
 0x146   : > { %s383_s0 = scalar_lea.sflag [#allocation4], %s382_s26 }
 0x147   : > { %p515_p13 = pneg %p514_p10 }
 0x149   : > { %663 = dma.done.wait (%p515_p13), %s383_s0, 32  }
 0x14a   : > { %665 = vsyncadd (%p515_p13), %s383_s0, 4294967264  ;;  %s21_s14 = sadd.s32 1, %s688_s14   ;;  %s893_s9 = smov %s672_s10 }
 0x14b   : > { %p18_p0 = scmp.ge.s32.totalorder %s21_s14, 4   ;;  %s894_s10 = smov %s676_s11 }
 0x14c   : > { %s895_s11 = smov %s769_s23  ;;  %s896_s12 = smov %s684_s13 }
 0x14d   : > { %s897_s13 = smov %s899_s17  ;;  %20 = sbr.rel (!%p18_p0) target bundleno = 10 (0xa), region = 91 }
 0x152   :  { %389 = vsyncpa [#allocation3], 1 }
 0x153   :  { %391 = vsyncpa [#allocation3 + $0x1], 1 }
 0x154   :  { %392 = vsyncpa [#allocation6], 1 }
 0x155   :  { %394 = vsyncpa [#allocation6 + $0x1], 1 }
 0x156   :  { %395 = vsyncpa [#allocation4], 1 }
 0x157   :  { %397 = vsyncpa [#allocation4 + $0x1], 1 }

</bundles_post_ra>
